<compile_context>
chip_gen: v5e
topology: v5e:2x2
jax: 0.10.0
libtpu: 0.0.40
codegen_flags: <defaults>
</compile_context>

<pallas_src>
import math
from functools import partial

import numpy as np
import jax
import jax.numpy as jnp
from jax import lax
from jax.experimental import pallas as pl
from jax.experimental.pallas import tpu as pltpu

SQRT2 = math.sqrt(2.0)
LRELU_SLOPE = 0.2
HIGH = lax.Precision.HIGHEST          # used only by the pure-JAX reference

# Dense (cropped) in-kernel writeback is a static per-row unroll; above this
# many output rows fall back to flat layout + an XLA crop (see TODO above).
_DENSE_ROW_UNROLL_MAX = 32
# Single-buffer the per-sample x block above this size: it is revisited across
# all OC tiles of a sample, so the 2nd pipeline buffer is dead weight.
_SINGLE_BUFFER_X_BYTES = 4 * 1024 * 1024


# ---------------------------------------------------------------------------
# Small helpers
# ---------------------------------------------------------------------------
def _vmem_limit_bytes():
    """~3/4 of physical VMEM: ~96 MiB on 128 MiB chips (v5e/v6e), ~48 on v7x."""
    try:
        return int(pltpu.get_tpu_info().vmem_capacity_bytes * 3 // 4)
    except Exception:
        return 32 * 1024 * 1024        # conservative fallback


def _compiler_params(dim_sems, vmem_limit=None):
    kwargs = dict(dimension_semantics=dim_sems)
    if vmem_limit:
        kwargs["vmem_limit_bytes"] = int(vmem_limit)
    return pltpu.CompilerParams(**kwargs)


def _largest_divisor_leq(n, cap, multiple=1):
    """Largest divisor of n that is <= cap and (a multiple of `multiple` or n)."""
    cap = max(1, min(n, cap))
    for d in range(cap, 0, -1):
        if n % d == 0 and (d % multiple == 0 or d == n):
            return d
    return n


def _pick_oc_tile(OC, Cin, L, N, out_elem_bytes, vmem_limit):
    """Largest OC tile (<=256, MXU-native M on v6e/v7x; still fine as 2 passes
    on v5e's 128-wide MXU) whose pipelined blocks fit the VMEM budget."""
    # Residents shared across OC tiles (single copy): x block, 9-tap stack,
    # noise block.  Per-OC-tile blocks are double-buffered by the pipeline.
    shared = 2 * Cin * L + 2 * 9 * Cin * N + 2 * N
    budget = int(vmem_limit * 0.7) - shared
    divisors = [d for d in range(1, min(OC, 256) + 1)
                if OC % d == 0 and (d % 8 == 0 or d == OC)]
    if not divisors:
        divisors = [d for d in range(1, OC + 1) if OC % d == 0]
    for cand in sorted(divisors, reverse=True):
        per_tile = 2 * (2 * cand * 9 * Cin           # w block (bf16, 2 bufs)
                        + out_elem_bytes * cand * N  # out block (2 bufs)
                        + 4 * cand)                  # bias
        if per_tile <= budget:
            return cand
    return min(divisors)


# ---------------------------------------------------------------------------
# Pallas kernel 1: modulated 3x3 conv (+ bias + noise + LeakyReLU, gain folded)
# ---------------------------------------------------------------------------
def _mod_conv_kernel(x_ref, w_ref, b_ref, n_ref, o_ref, stk_ref, *, wp, dense_w):
    # x_ref  : (1, Cin, L)      bf16 zero-padded flat image, row stride wp
    # w_ref  : (1, OCB, 9*Cin)  bf16 modulated weights, index (kh*3+kw)*Cin+cin
    # b_ref  : (OCB, 1)         f32 bias (already * sqrt(2))
    # n_ref  : (1, 1, N)        bf16 noise term (already * scale * sqrt(2))
    # o_ref  : (1, OCB, N) flat layout, or (1, OCB, out_rows, dense_w) dense
    # stk_ref: (9*Cin, N)       bf16 shift-and-stack scratch (per sample)
    cin = x_ref.shape[1]
    n = stk_ref.shape[1]

    # Build the 9-tap shifted stack once per sample (OC-tile index 0); it is
    # reused by every OC tile of this sample, so the lane-realignment cost is
    # paid once and the MXU sees a single K = 9*Cin contraction.
    @pl.when(pl.program_id(1) == 0)
    def _():
        for k in range(9):                                    # static unroll
            kh, kw = divmod(k, 3)
            off = kh * wp + kw
            stk_ref[pl.ds(k * cin, cin), :] = x_ref[0, :, off:off + n]

    acc = jnp.dot(w_ref[0], stk_ref[...], preferred_element_type=jnp.float32)
    z = acc + b_ref[...] + n_ref[0].astype(jnp.float32)
    z = jnp.where(z >= 0.0, z, LRELU_SLOPE * z)

    if dense_w is None:
        o_ref[0] = z.astype(o_ref.dtype)          # flat padded layout
    else:
        # Lane-dense store: drop the 2 padding lanes of every row so no extra
        # HBM crop pass is needed downstream.
        for r in range(o_ref.shape[2]):                       # static unroll
            o_ref[0, :, r, :] = z[:, r * wp:r * wp + dense_w].astype(o_ref.dtype)


def modulated_conv_act(x_flat, w9, bias2, noise_flat, *, wp, out_rows,
                       out_dtype, oc_tile=None, dense_width=None):
    """Modulated 3x3 conv + bias + noise + LeakyReLU (sqrt(2) pre-folded).

    x_flat:     (B, Cin, L) bf16, zero-padded image flattened row-major with
                row stride `wp` (= W + 2); L >= (out_rows + 2) * wp + 2.
    w9:         (B, OC, 9*Cin) bf16 modulated weights, tap-major.
    bias2:      (OC, 1) f32.
    noise_flat: (B, 1, out_rows * wp) bf16.
    Returns (B, OC, out_rows * wp) flat (dense_width=None), lanes w >= W of
    each row garbage; otherwise (B, OC, out_rows, dense_width) lane-dense.
    """
    B, Cin, L = x_flat.shape
    OC, K9 = w9.shape[1], w9.shape[2]
    N = out_rows * wp
    assert K9 == 9 * Cin
    assert L >= (out_rows + 2) * wp + 2
    assert dense_width is None or dense_width <= wp - 2

    vmem_limit = _vmem_limit_bytes()
    if oc_tile is None:
        oc_tile = _pick_oc_tile(OC, Cin, L, N, np.dtype(out_dtype).itemsize,
                                vmem_limit)
    assert OC % oc_tile == 0 and (oc_tile % 8 == 0 or oc_tile == OC)

    dense_in_kernel = dense_width is not None and out_rows <= _DENSE_ROW_UNROLL_MAX
    if dense_in_kernel:
        out_shape = jax.ShapeDtypeStruct((B, OC, out_rows, dense_width), out_dtype)
        out_spec = pl.BlockSpec((1, oc_tile, out_rows, dense_width),
                                lambda b, t: (b, t, 0, 0))
    else:
        out_shape = jax.ShapeDtypeStruct((B, OC, N), out_dtype)
        out_spec = pl.BlockSpec((1, oc_tile, N), lambda b, t: (b, t, 0))

    # The x block index is constant along the OC-tile axis; when it is big,
    # drop to a single pipeline buffer (v7x: only 64 MiB of VMEM).
    x_spec_kwargs = {}
    if Cin * L * 2 > _SINGLE_BUFFER_X_BYTES:
        x_spec_kwargs["pipeline_mode"] = pl.Buffered(1)

    kernel = partial(_mod_conv_kernel, wp=wp,
                     dense_w=dense_width if dense_in_kernel else None)
    out = pl.pallas_call(
        kernel,
        out_shape=out_shape,
        grid=(B, OC // oc_tile),
        in_specs=[
            pl.BlockSpec((1, Cin, L), lambda b, t: (b, 0, 0), **x_spec_kwargs),
            pl.BlockSpec((1, oc_tile, K9), lambda b, t: (b, t, 0)),
            pl.BlockSpec((oc_tile, 1), lambda b, t: (t, 0)),
            pl.BlockSpec((1, 1, N), lambda b, t: (b, 0, 0)),
        ],
        out_specs=out_spec,
        scratch_shapes=[pltpu.VMEM((K9, N), jnp.bfloat16)],
        # OC-tile axis stays on one core ("arbitrary"): the per-sample stack
        # scratch built at tile 0 must be visible to the remaining tiles.
        compiler_params=_compiler_params(("parallel", "arbitrary"), vmem_limit),
    )(x_flat, w9, bias2, noise_flat)

    if dense_width is not None and not dense_in_kernel:
        # TODO(synk): row-banded grid with halo DMA for large out_rows so this
        #             extra HBM crop pass disappears there as well.
        out = out.reshape(B, OC, out_rows, wp)[..., :dense_width]
    return out


# ---------------------------------------------------------------------------
# Pallas kernel 2: bilinear x2 upsample (align_corners=True) + binomial Blur,
# emitted directly in the zero-padded flat layout that conv2 consumes.
# ---------------------------------------------------------------------------
def _upblur_kernel(x_ref, mh_ref, mwt_ref, o_ref):
    # x_ref  : (1, CB, H, Wp)   bf16 (lanes >= W of each row are garbage)
    # mh_ref : (R, H)           bf16 (rows 0 / 2H+1 / 2H+2 are zero = pad rows)
    # mwt_ref: (Wp, Wp2)        bf16 (kills garbage lanes, adds width padding)
    # o_ref  : (1, CB, R, Wp2)
    cb, h, wp = x_ref.shape[1], x_ref.shape[2], x_ref.shape[3]
    r, wp2 = o_ref.shape[2], o_ref.shape[3]
    mh_b = pl.broadcast_to(mh_ref[...], (cb, r, h))          # hoisted once
    if h % 8 == 0:
        # Width pass as one wide (cb*h, wp) @ (wp, wp2) MXU matmul.
        t = jnp.dot(x_ref[0].reshape(cb * h, wp), mwt_ref[...],
                    preferred_element_type=jnp.float32)
        t = t.reshape(cb, h, wp2).astype(jnp.bfloat16)
    else:
        mwt_b = pl.broadcast_to(mwt_ref[...], (cb, wp, wp2))
        t = lax.dot_general(x_ref[0], mwt_b, (((2,), (1,)), ((0,), (0,))),
                            preferred_element_type=jnp.float32).astype(jnp.bfloat16)
    # Height pass: one channel-batched matmul (no per-channel Python unroll).
    o = lax.dot_general(mh_b, t, (((2,), (1,)), ((0,), (0,))),
                        preferred_element_type=jnp.float32)
    o_ref[0] = o.astype(o_ref.dtype)


def upsample_blur_pad(y, mh_ext, mwt_ext, *, ch_tile=None):
    """y: (B, C, H, W+2) bf16 -> (B, C, 2H+3, 2W+2) bf16 (padded layout)."""
    B, C, H, Wp = y.shape
    R, H_in = mh_ext.shape
    Wp2 = mwt_ext.shape[1]
    assert H_in == H and mwt_ext.shape[0] == Wp

    vmem_limit = _vmem_limit_bytes()
    if ch_tile is None:
        # Budget against the real pipelined footprint: bf16 in + out blocks,
        # double-buffered, plus the per-channel broadcast of mh in the kernel.
        per_ch = 2 * 2 * (H * Wp + R * Wp2) + 2 * R * H
        ch_tile = _largest_divisor_leq(C, max(1, (vmem_limit // 6) // per_ch))
    assert C % ch_tile == 0

    return pl.pallas_call(
        _upblur_kernel,
        out_shape=jax.ShapeDtypeStruct((B, C, R, Wp2), jnp.bfloat16),
        grid=(B, C // ch_tile),
        in_specs=[
            pl.BlockSpec((1, ch_tile, H, Wp), lambda b, c: (b, c, 0, 0)),
            pl.BlockSpec((R, H), lambda b, c: (0, 0)),
            pl.BlockSpec((Wp, Wp2), lambda b, c: (0, 0)),
        ],
        out_specs=pl.BlockSpec((1, ch_tile, R, Wp2), lambda b, c: (b, c, 0, 0)),
        compiler_params=_compiler_params(("parallel", "parallel"), vmem_limit),
    )(y, mh_ext, mwt_ext)


# ---------------------------------------------------------------------------
# Glue: static interpolation / blur matrices, weight modulation, layout prep
# ---------------------------------------------------------------------------
def _binomial_filter(filter_size):
    def c(n, k):
        if k <= 0 or n <= k:
            return 1
        return c(n - 1, k - 1) + c(n - 1, k)
    return [c(filter_size - 1, j) for j in range(filter_size)]


def _bilinear_matrix(n_in, n_out):
    # torch F.interpolate(mode='bilinear', align_corners=True), 1-D factor
    M = np.zeros((n_out, n_in), np.float32)
    scale = (n_in - 1) / (n_out - 1) if n_out > 1 else 0.0
    for i in range(n_out):
        src = i * scale
        i0 = min(int(np.floor(src)), n_in - 1)
        i1 = min(i0 + 1, n_in - 1)
        f = src - i0
        M[i, i0] += 1.0 - f
        M[i, i1] += f
    return M


def _blur_matrix(n, filter_size):
    # Blur: F.pad(left=top=fs//2, right=bottom=(fs-1)//2) + depthwise conv
    f = np.array(_binomial_filter(filter_size), np.float32)
    f = f / f.sum()                      # 1-D factor of the separable kernel
    p1 = filter_size // 2
    M = np.zeros((n, n), np.float32)
    for i in range(n):
        for u in range(filter_size):
            j = i + u - p1
            if 0 <= j < n:
                M[i, j] += f[u]
    return M


def _base_upblur_matrices(H, W, filter_size=4):
    mh0 = _blur_matrix(2 * H, filter_size) @ _bilinear_matrix(H, 2 * H)  # (2H,H)
    mw0 = _blur_matrix(2 * W, filter_size) @ _bilinear_matrix(W, 2 * W)  # (2W,W)
    return mh0, mw0


def _padded_upblur_matrices(H, W, filter_size=4):
    """Extend the up/blur matrices so the kernel output is already the
    zero-padded (+1 spare row) flat image conv2 expects, and so the garbage
    lanes of the conv1 output are zeroed inside the matmul for free."""
    mh0, mw0 = _base_upblur_matrices(H, W, filter_size)
    Wp, Wp2 = W + 2, 2 * W + 2
    mh = np.zeros((2 * H + 3, H), np.float32)
    mh[1:1 + 2 * H, :] = mh0                 # rows 0 / 2H+1 / 2H+2 stay zero
    mwt = np.zeros((Wp, Wp2), np.float32)
    mwt[:W, 1:1 + 2 * W] = mw0.T             # garbage lanes -> zero weight
    return (jnp.asarray(mh, jnp.bfloat16), jnp.asarray(mwt, jnp.bfloat16))


def modulate_weight(style, aff_w, aff_b, weight, gain=1.0, post_gain=1.0):
    """ModulatedConv2d weight prep (ELR-affine, modulation, demodulation).
    `post_gain` is applied after demodulation (used to fold sqrt(2))."""
    sd = style.shape[1]
    OC, Cin, K, _ = weight.shape
    s = (style * (1.0 / math.sqrt(sd))) @ aff_w.T + aff_b + 1.0     # (B, Cin)
    conv_scale = gain / math.sqrt(OC * Cin * K * K)
    w = weight[None] * s[:, None, :, None, None] * conv_scale
    d = lax.rsqrt(jnp.sum(w * w, axis=(2, 3, 4), keepdims=True) + 1e-4)
    return w * d * post_gain                                        # (B,OC,Cin,K,K)


def _pad_flatten_input(x):
    """(B, C, H, W) -> (B, C, (H+3)*(W+2)) bf16, zero-padded, row stride W+2."""
    B, C, H, W = x.shape
    xp = jnp.pad(x, ((0, 0), (0, 0), (1, 2), (1, 1)))
    return xp.reshape(B, C, (H + 3) * (W + 2)).astype(jnp.bfloat16)


def _prep_noise(noise, scale, W):
    """(B, 1, H, W) -> (B, 1, H*(W+2)) bf16 scaled noise in padded-row layout."""
    B, _, H, _ = noise.shape
    n = jnp.pad(noise * scale, ((0, 0), (0, 0), (0, 0), (0, 2)))
    return n.reshape(B, 1, H * (W + 2)).astype(jnp.bfloat16)


def _prep_weights(w_mod):
    """(B, OC, Cin, 3, 3) -> (B, OC, 9*Cin) bf16, index (kh*3+kw)*Cin + cin."""
    B, OC, Cin = w_mod.shape[:3]
    return (jnp.transpose(w_mod, (0, 1, 3, 4, 2))
            .reshape(B, OC, 9 * Cin).astype(jnp.bfloat16))


# ---------------------------------------------------------------------------
# StyleBlock forward (no_pad=False, filter_size=4, act='lrelu', gain=1.0)
# ---------------------------------------------------------------------------
def style_block_forward(x, styles, noises, params, *, filter_size=4,
                        oc_tile=None, ch_tile=None, out_dtype=jnp.bfloat16):
    B, Cin, H, W = x.shape
    OC = params["w1"].shape[0]
    Wp, Wp2 = W + 2, 2 * W + 2

    # conv1 + noise + LeakyReLU (sqrt(2) folded into weights / bias / noise)
    w1 = modulate_weight(styles[0], params["aff1_w"], params["aff1_b"],
                         params["w1"], post_gain=SQRT2)
    y = modulated_conv_act(
        _pad_flatten_input(x), _prep_weights(w1),
        (params["b1"] * SQRT2).reshape(OC, 1).astype(jnp.float32),
        _prep_noise(noises[0], params["ns1"] * SQRT2, W),
        wp=Wp, out_rows=H, out_dtype=jnp.bfloat16, oc_tile=oc_tile)
    y = y.reshape(B, OC, H, Wp)          # free reshape; lanes >= W are garbage

    # bilinear x2 + Blur, emitted directly in conv2's zero-padded layout
    mh_ext, mwt_ext = _padded_upblur_matrices(H, W, filter_size)
    y = upsample_blur_pad(y, mh_ext, mwt_ext, ch_tile=ch_tile)  # (B,OC,2H+3,2W+2)

    # conv2 + noise + LeakyReLU, lane-dense (cropped) writeback
    w2 = modulate_weight(styles[1], params["aff2_w"], params["aff2_b"],
                         params["w2"], post_gain=SQRT2)
    y = modulated_conv_act(
        y.reshape(B, OC, (2 * H + 3) * Wp2),   # already padded + flattened
        _prep_weights(w2),
        (params["b2"] * SQRT2).reshape(OC, 1).astype(jnp.float32),
        _prep_noise(noises[1], params["ns2"] * SQRT2, 2 * W),
        wp=Wp2, out_rows=2 * H, out_dtype=out_dtype, oc_tile=oc_tile,
        dense_width=2 * W)
    return y                                  # (B, OC, 2H, 2W)


# ---------------------------------------------------------------------------
# Pure-JAX f32 reference (lax.conv, HIGHEST precision) for correctness check
# ---------------------------------------------------------------------------
def _ref_forward(x, styles, noises, params, filter_size=4):
    B, Cin, H, W = x.shape
    mh0, mw0 = _base_upblur_matrices(H, W, filter_size)
    mh0 = jnp.asarray(mh0)
    mw0t = jnp.asarray(mw0.T)

    def gconv(xx, ww):
        def one(xb, wb):
            return lax.conv_general_dilated(
                xb[None], wb, (1, 1), ((1, 1), (1, 1)),
                dimension_numbers=("NCHW", "OIHW", "NCHW"),
                precision=HIGH)[0]
        return jax.vmap(one)(xx, ww)

    def act(v):
        return jnp.where(v >= 0, v, LRELU_SLOPE * v) * SQRT2

    w1m = modulate_weight(styles[0], params["aff1_w"], params["aff1_b"],
                          params["w1"])
    y = gconv(x, w1m) + params["b1"].reshape(1, -1, 1, 1)
    y = act(y + noises[0] * params["ns1"])
    y = jnp.einsum("ph,bchw->bcpw", mh0, y, precision=HIGH)
    y = jnp.einsum("bcpw,wq->bcpq", y, mw0t, precision=HIGH)
    w2m = modulate_weight(styles[1], params["aff2_w"], params["aff2_b"],
                          params["w2"])
    y = gconv(y, w2m) + params["b2"].reshape(1, -1, 1, 1)
    y = act(y + noises[1] * params["ns2"])
    return y


if __name__ == "__main__":
    B, Cin, SD, OC, R = 2, 4, 8, 16, 8   # batch, in_ch, style_dim, out_ch, res

    key = jax.random.PRNGKey(0)
    ks = jax.random.split(key, 14)
    x = jax.random.normal(ks[0], (B, Cin, R, R), jnp.float32)
    style1 = jax.random.normal(ks[1], (B, SD), jnp.float32)
    style2 = jax.random.normal(ks[2], (B, SD), jnp.float32)
    noise1 = jax.random.normal(ks[3], (B, 1, R, R), jnp.float32)
    noise2 = jax.random.normal(ks[4], (B, 1, 2 * R, 2 * R), jnp.float32)

    # Deterministic synthetic parameters (shapes per module __init__).
    # torch inits conv bias / noise scale to zero; nonzero values used here so
    # those code paths are exercised.
    params = {
        "aff1_w": jax.random.normal(ks[5], (Cin, SD), jnp.float32) * 0.2,
        "aff1_b": jax.random.normal(ks[6], (Cin,), jnp.float32) * 0.1,
        "w1":     jax.random.normal(ks[7], (OC, Cin, 3, 3), jnp.float32),
        "b1":     jax.random.normal(ks[8], (OC,), jnp.float32) * 0.1,
        "ns1":    0.15,
        "aff2_w": jax.random.normal(ks[9], (OC, SD), jnp.float32) * 0.2,
        "aff2_b": jax.random.normal(ks[10], (OC,), jnp.float32) * 0.1,
        "w2":     jax.random.normal(ks[11], (OC, OC, 3, 3), jnp.float32),
        "b2":     jax.random.normal(ks[12], (OC,), jnp.float32) * 0.1,
        "ns2":    0.25,
    }

    # oc_tile / ch_tile chosen so the multi-tile grid paths (stack reuse across
    # OC tiles, multi-block upblur) are exercised even at these toy shapes.
    out = style_block_forward(x, [style1, style2], [noise1, noise2], params,
                              oc_tile=8, ch_tile=8)
    out = jax.block_until_ready(out)
    assert out.shape == (B, OC, 2 * R, 2 * R), out.shape

    ref = jax.block_until_ready(
        _ref_forward(x, [style1, style2], [noise1, noise2], params))
    max_diff = float(jnp.max(jnp.abs(out.astype(jnp.float32) - ref)))
    # bf16 MXU + bf16 intermediate / writeback tolerance
    tol = 5e-2 + 3e-2 * float(jnp.max(jnp.abs(ref)))
    if not (max_diff <= tol):
        raise AssertionError(f"mismatch vs reference: max|diff|={max_diff} "
                             f"(tol={tol})")

    print("KERNEL_OK")
</pallas_src>

<mosaic_0001>
module attributes {stable_mosaic.version = 11 : i64} {
  func.func @_mod_conv_kernel(%arg0: i32, %arg1: i32, %arg2: memref<1x4x110xbf16, #tpu.memory_space<vmem>>, %arg3: memref<1x8x36xbf16, #tpu.memory_space<vmem>>, %arg4: memref<8x1xf32, #tpu.memory_space<vmem>>, %arg5: memref<1x1x80xbf16, #tpu.memory_space<vmem>>, %arg6: memref<1x8x80xbf16, #tpu.memory_space<vmem>>, %arg7: memref<36x80xbf16, #tpu.memory_space<vmem>>) attributes {dimension_semantics = [#tpu.dimension_semantics<parallel>, #tpu.dimension_semantics<arbitrary>], iteration_bounds = array<i64: 2, 2>, scalar_prefetch = 0 : i64, scratch_operands = 1 : i64, tpu.core_type = #tpu.core_type<tc>, window_params = [{transform_indices = @transform_0, window_bounds = array<i64: 1, 4, 110>}, {transform_indices = @transform_1, window_bounds = array<i64: 1, 8, 36>}, {transform_indices = @transform_2, window_bounds = array<i64: 8, 1>}, {transform_indices = @transform_3, window_bounds = array<i64: 1, 1, 80>}, {transform_indices = @transform_4, window_bounds = array<i64: 1, 8, 80>}]} {
    %c0_i32 = arith.constant 0 : i32
    %0 = arith.cmpi eq, %arg1, %c0_i32 : i32
    %1 = arith.extui %0 : i1 to i32
    %c0_i32_0 = arith.constant 0 : i32
    %2 = arith.cmpi ne, %1, %c0_i32_0 : i32
    scf.if %2 {
      %c0_15 = arith.constant 0 : index
      %c0_16 = arith.constant 0 : index
      %c0_17 = arith.constant 0 : index
      %24 = vector.load %arg2[%c0_15, %c0_16, %c0_17] : memref<1x4x110xbf16, #tpu.memory_space<vmem>>, vector<1x4x80xbf16>
      %25 = vector.shape_cast %24 : vector<1x4x80xbf16> to vector<4x80xbf16>
      %c0_18 = arith.constant 0 : index
      %c0_19 = arith.constant 0 : index
      %26 = vector.load %arg7[%c0_18, %c0_19] : memref<36x80xbf16, #tpu.memory_space<vmem>>, vector<4x80xbf16>
      tpu.vector_store %arg7[%c0_18, %c0_19], %25 {strides = array<i32>} : memref<36x80xbf16, #tpu.memory_space<vmem>>, vector<4x80xbf16>,
      %c0_20 = arith.constant 0 : index
      %c0_21 = arith.constant 0 : index
      %c1 = arith.constant 1 : index
      %27 = vector.load %arg2[%c0_20, %c0_21, %c1] : memref<1x4x110xbf16, #tpu.memory_space<vmem>>, vector<1x4x80xbf16>
      %28 = vector.shape_cast %27 : vector<1x4x80xbf16> to vector<4x80xbf16>
      %c4 = arith.constant 4 : index
      %c0_22 = arith.constant 0 : index
      %29 = vector.load %arg7[%c4, %c0_22] : memref<36x80xbf16, #tpu.memory_space<vmem>>, vector<4x80xbf16>
      tpu.vector_store %arg7[%c4, %c0_22], %28 {strides = array<i32>} : memref<36x80xbf16, #tpu.memory_space<vmem>>, vector<4x80xbf16>,
      %c0_23 = arith.constant 0 : index
      %c0_24 = arith.constant 0 : index
      %c2 = arith.constant 2 : index
      %30 = vector.load %arg2[%c0_23, %c0_24, %c2] : memref<1x4x110xbf16, #tpu.memory_space<vmem>>, vector<1x4x80xbf16>
      %31 = vector.shape_cast %30 : vector<1x4x80xbf16> to vector<4x80xbf16>
      %c8 = arith.constant 8 : index
      %c0_25 = arith.constant 0 : index
      %32 = vector.load %arg7[%c8, %c0_25] : memref<36x80xbf16, #tpu.memory_space<vmem>>, vector<4x80xbf16>
      tpu.vector_store %arg7[%c8, %c0_25], %31 {strides = array<i32>} : memref<36x80xbf16, #tpu.memory_space<vmem>>, vector<4x80xbf16>,
      %c0_26 = arith.constant 0 : index
      %c0_27 = arith.constant 0 : index
      %c10 = arith.constant 10 : index
      %33 = vector.load %arg2[%c0_26, %c0_27, %c10] : memref<1x4x110xbf16, #tpu.memory_space<vmem>>, vector<1x4x80xbf16>
      %34 = vector.shape_cast %33 : vector<1x4x80xbf16> to vector<4x80xbf16>
      %c12 = arith.constant 12 : index
      %c0_28 = arith.constant 0 : index
      %35 = vector.load %arg7[%c12, %c0_28] : memref<36x80xbf16, #tpu.memory_space<vmem>>, vector<4x80xbf16>
      tpu.vector_store %arg7[%c12, %c0_28], %34 {strides = array<i32>} : memref<36x80xbf16, #tpu.memory_space<vmem>>, vector<4x80xbf16>,
      %c0_29 = arith.constant 0 : index
      %c0_30 = arith.constant 0 : index
      %c11 = arith.constant 11 : index
      %36 = vector.load %arg2[%c0_29, %c0_30, %c11] : memref<1x4x110xbf16, #tpu.memory_space<vmem>>, vector<1x4x80xbf16>
      %37 = vector.shape_cast %36 : vector<1x4x80xbf16> to vector<4x80xbf16>
      %c16 = arith.constant 16 : index
      %c0_31 = arith.constant 0 : index
      %38 = vector.load %arg7[%c16, %c0_31] : memref<36x80xbf16, #tpu.memory_space<vmem>>, vector<4x80xbf16>
      tpu.vector_store %arg7[%c16, %c0_31], %37 {strides = array<i32>} : memref<36x80xbf16, #tpu.memory_space<vmem>>, vector<4x80xbf16>,
      %c0_32 = arith.constant 0 : index
      %c0_33 = arith.constant 0 : index
      %c12_34 = arith.constant 12 : index
      %39 = vector.load %arg2[%c0_32, %c0_33, %c12_34] : memref<1x4x110xbf16, #tpu.memory_space<vmem>>, vector<1x4x80xbf16>
      %40 = vector.shape_cast %39 : vector<1x4x80xbf16> to vector<4x80xbf16>
      %c20 = arith.constant 20 : index
      %c0_35 = arith.constant 0 : index
      %41 = vector.load %arg7[%c20, %c0_35] : memref<36x80xbf16, #tpu.memory_space<vmem>>, vector<4x80xbf16>
      tpu.vector_store %arg7[%c20, %c0_35], %40 {strides = array<i32>} : memref<36x80xbf16, #tpu.memory_space<vmem>>, vector<4x80xbf16>,
      %c0_36 = arith.constant 0 : index
      %c0_37 = arith.constant 0 : index
      %c20_38 = arith.constant 20 : index
      %42 = vector.load %arg2[%c0_36, %c0_37, %c20_38] : memref<1x4x110xbf16, #tpu.memory_space<vmem>>, vector<1x4x80xbf16>
      %43 = vector.shape_cast %42 : vector<1x4x80xbf16> to vector<4x80xbf16>
      %c24 = arith.constant 24 : index
      %c0_39 = arith.constant 0 : index
      %44 = vector.load %arg7[%c24, %c0_39] : memref<36x80xbf16, #tpu.memory_space<vmem>>, vector<4x80xbf16>
      tpu.vector_store %arg7[%c24, %c0_39], %43 {strides = array<i32>} : memref<36x80xbf16, #tpu.memory_space<vmem>>, vector<4x80xbf16>,
      %c0_40 = arith.constant 0 : index
      %c0_41 = arith.constant 0 : index
      %c21 = arith.constant 21 : index
      %45 = vector.load %arg2[%c0_40, %c0_41, %c21] : memref<1x4x110xbf16, #tpu.memory_space<vmem>>, vector<1x4x80xbf16>
      %46 = vector.shape_cast %45 : vector<1x4x80xbf16> to vector<4x80xbf16>
      %c28 = arith.constant 28 : index
      %c0_42 = arith.constant 0 : index
      %47 = vector.load %arg7[%c28, %c0_42] : memref<36x80xbf16, #tpu.memory_space<vmem>>, vector<4x80xbf16>
      tpu.vector_store %arg7[%c28, %c0_42], %46 {strides = array<i32>} : memref<36x80xbf16, #tpu.memory_space<vmem>>, vector<4x80xbf16>,
      %c0_43 = arith.constant 0 : index
      %c0_44 = arith.constant 0 : index
      %c22 = arith.constant 22 : index
      %48 = vector.load %arg2[%c0_43, %c0_44, %c22] : memref<1x4x110xbf16, #tpu.memory_space<vmem>>, vector<1x4x80xbf16>
      %49 = vector.shape_cast %48 : vector<1x4x80xbf16> to vector<4x80xbf16>
      %c32 = arith.constant 32 : index
      %c0_45 = arith.constant 0 : index
      %50 = vector.load %arg7[%c32, %c0_45] : memref<36x80xbf16, #tpu.memory_space<vmem>>, vector<4x80xbf16>
      tpu.vector_store %arg7[%c32, %c0_45], %49 {strides = array<i32>} : memref<36x80xbf16, #tpu.memory_space<vmem>>, vector<4x80xbf16>,
    } else {
    }
    %c0 = arith.constant 0 : index
    %c0_1 = arith.constant 0 : index
    %c0_2 = arith.constant 0 : index
    %3 = vector.load %arg3[%c0, %c0_1, %c0_2] : memref<1x8x36xbf16, #tpu.memory_space<vmem>>, vector<1x8x36xbf16>
    %4 = vector.shape_cast %3 : vector<1x8x36xbf16> to vector<8x36xbf16>
    %c0_3 = arith.constant 0 : index
    %c0_4 = arith.constant 0 : index
    %5 = vector.load %arg7[%c0_3, %c0_4] : memref<36x80xbf16, #tpu.memory_space<vmem>>, vector<36x80xbf16>
    %cst = arith.constant dense<0.000000e+00> : vector<8x80xf32>
    %6 = tpu.matmul %4, %5, %cst {dimension_numbers = #tpu.dot_dimension_numbers<[1], [0], [0], [1], [0, 0, 1, 1], [], []>} : vector<8x36xbf16>, vector<36x80xbf16>, vector<8x80xf32> -> vector<8x80xf32>
    %c0_5 = arith.constant 0 : index
    %c0_6 = arith.constant 0 : index
    %7 = vector.load %arg4[%c0_5, %c0_6] : memref<8x1xf32, #tpu.memory_space<vmem>>, vector<8x1xf32>
    %8 = vector.broadcast %7 : vector<8x1xf32> to vector<8x80xf32>
    %9 = arith.addf %6, %8 : vector<8x80xf32>
    %c0_7 = arith.constant 0 : index
    %c0_8 = arith.constant 0 : index
    %c0_9 = arith.constant 0 : index
    %10 = vector.load %arg5[%c0_7, %c0_8, %c0_9] : memref<1x1x80xbf16, #tpu.memory_space<vmem>>, vector<1x1x80xbf16>
    %11 = vector.shape_cast %10 : vector<1x1x80xbf16> to vector<1x80xbf16>
    %12 = arith.extf %11 : vector<1x80xbf16> to vector<1x80xf32>
    %13 = vector.broadcast %12 : vector<1x80xf32> to vector<8x80xf32>
    %14 = arith.addf %9, %13 : vector<8x80xf32>
    %cst_10 = arith.constant 0.000000e+00 : f32
    %15 = vector.broadcast %cst_10 : f32 to vector<8x80xf32>
    %16 = arith.cmpf oge, %14, %15 : vector<8x80xf32>
    %cst_11 = arith.constant 2.000000e-01 : f32
    %17 = vector.broadcast %cst_11 : f32 to vector<8x80xf32>
    %18 = arith.mulf %17, %14 : vector<8x80xf32>
    %19 = arith.select %16, %14, %18 : vector<8x80xi1>, vector<8x80xf32>
    %20 = arith.truncf %19 : vector<8x80xf32> to vector<8x80xbf16>
    %c0_12 = arith.constant 0 : index
    %c0_13 = arith.constant 0 : index
    %c0_14 = arith.constant 0 : index
    %21 = vector.load %arg6[%c0_12, %c0_13, %c0_14] : memref<1x8x80xbf16, #tpu.memory_space<vmem>>, vector<1x8x80xbf16>
    %22 = vector.shape_cast %21 : vector<1x8x80xbf16> to vector<8x80xbf16>
    %23 = vector.shape_cast %20 : vector<8x80xbf16> to vector<1x8x80xbf16>
    tpu.vector_store %arg6[%c0_12, %c0_13, %c0_14], %23 {strides = array<i32>} : memref<1x8x80xbf16, #tpu.memory_space<vmem>>, vector<1x8x80xbf16>,
    return
  }
  func.func @transform_0(%arg0: i32, %arg1: i32) -> (i32, i32, i32) {
    %c0_i32 = arith.constant 0 : i32
    %c0_i32_0 = arith.constant 0 : i32
    %c0_i32_1 = arith.constant 0 : i32
    return %arg0, %c0_i32, %c0_i32_0 : i32, i32, i32
  }
  func.func @transform_1(%arg0: i32, %arg1: i32) -> (i32, i32, i32) {
    %c0_i32 = arith.constant 0 : i32
    %c0_i32_0 = arith.constant 0 : i32
    return %arg0, %arg1, %c0_i32 : i32, i32, i32
  }
  func.func @transform_2(%arg0: i32, %arg1: i32) -> (i32, i32) {
    %c0_i32 = arith.constant 0 : i32
    %c0_i32_0 = arith.constant 0 : i32
    return %arg1, %c0_i32 : i32, i32
  }
  func.func @transform_3(%arg0: i32, %arg1: i32) -> (i32, i32, i32) {
    %c0_i32 = arith.constant 0 : i32
    %c0_i32_0 = arith.constant 0 : i32
    %c0_i32_1 = arith.constant 0 : i32
    return %arg0, %c0_i32, %c0_i32_0 : i32, i32, i32
  }
  func.func @transform_4(%arg0: i32, %arg1: i32) -> (i32, i32, i32) {
    %c0_i32 = arith.constant 0 : i32
    %c0_i32_0 = arith.constant 0 : i32
    return %arg0, %arg1, %c0_i32 : i32, i32, i32
  }
}

</mosaic_0001>

<bundles_post_ra>
// kernel: tpu_custom_call.1
= control target key start
LH: loop header
LB: loop body
LE: loop exit
PB: predicated region body
PF: predicated region fallthrough
CT: control target
= control target key end

     0   :  { %s1125_s0 = inlined_call_operand.hbm [shape: bf16[2,4,110], index: 0, kind: input, shape index: {}]   ;;  %s1126_s1 = inlined_call_operand.vmem [shape: bf16[2,16,36], index: 1, kind: input, shape index: {}]   ;;  %s1127_s2 = inlined_call_operand.vmem [shape: f32[16,1], index: 2, kind: input, shape index: {}]   ;;  %s1128_s3 = inlined_call_operand.vmem [shape: bf16[2,1,80], index: 3, kind: input, shape index: {}]   ;;  %s1129_s4 = inlined_call_operand.hbm [shape: bf16[2,16,80], index: 4, kind: output, shape index: {}]  }
   0x1   :  { %1137 = sst [smem:[#allocation16_spill]] %s1125_s0 }
   0x2   :  { %9 = vsyncpa [#allocation4], 0 }
   0x3   :  { %11 = vsyncpa [#allocation4 + $0x1], 0 }
   0x4   :  { %12 = vsyncpa [#allocation5], 0 }
   0x5   :  { %14 = vsyncpa [#allocation5 + $0x1], 0  ;;  %s903_s15 = smov 0   ;;  %s905_s16 = smov 0  }
   0x6   :  { %s907_s17 = smov 0   ;;  %s909_s18 = smov 0  }
   0x7   :  { %s911_s19 = smov 0   ;;  %s913_s20 = smov 0  }
   0x8   :  { %s915_s21 = smov 0   ;;  %s917_s22 = smov 0  }
   0x9   :  { %s919_s23 = smov 0   ;;  %s921_s24 = smov 0  }
   0xa   :  { %s923_s25 = smov 0  }
   0xb LB: > { %1138 = sst [smem:[#allocation9_spill]] %s843_s19  ;;  %s574_s26 = sadd.s32 4294967295, %s867_s25   ;;  %s867_s25 = sphi %s923_s25, %s20_s25   ;;  %s863_s24 = sphi %s921_s24, %s1157_s24   ;;  %s859_s23 = sphi %s919_s23, %s1156_s23   ;;  %s855_s22 = sphi %s917_s22, %s1155_s22   ;;  %s851_s21 = sphi %s915_s21, %s1154_s21   ;;  %s847_s20 = sphi %s913_s20, %s1153_s20   ;;  %s843_s19 = sphi %s911_s19, %s1152_s19   ;;  %s839_s18 = sphi %s909_s18, %s1151_s18   ;;  %s835_s17 = sphi %s907_s17, %s1160_s17   ;;  %s831_s16 = sphi %s905_s16, %s1159_s16   ;;  %s827_s15 = sphi %s903_s15, %s1158_s15  }
   0xc   : > { %1139 = sst [smem:[#allocation10_spill]] %s847_s20  ;;  %s575_s27 = sadd.s32 4294967294, %s867_s25  }
   0xd   : > { %1140 = sst [smem:[#allocation11_spill]] %s859_s23  ;;  %s29_s28 = sadd.s32 1, %s859_s23 }
   0xe   : > { %1141 = sst [smem:[#allocation12_spill]] %s863_s24  ;;  %s32_s29 = sadd.s32 1, %s863_s24 }
   0xf   : > { %p30_p0 = scmp.ge.s32.totalorder %s29_s28, 2  ;;  %s39_s30 = sadd.s32 1, %s847_s20 }
  0x10   : > { %p46_p1 = scmp.ne.s32.totalorder %s847_s20, %s843_s19  ;;  %p47_p2 = scmp.eq.s32.totalorder %s867_s25, 0 }
  0x11   : > { %s1162_s28 = smov (%p30_p0, %s29_s28), 0  ;;  %s1164_s29 = smov (!%p30_p0, %s32_s29), %s863_s24 }
  0x12   : > { %1142 = sst [smem:[#allocation13_spill]] %s1162_s28  ;;  %p967_p3 = por %p47_p2, %p46_p1 }
  0x13   : > { %p52_p4 = scmp.ne.s32.totalorder %s843_s19, %s839_s18  ;;  %p34_p5 = scmp.ge.s32.totalorder %s1164_s29, 2 }
  0x14   : > { %p53_p6 = scmp.eq.s32.totalorder %s574_s26, 0  ;;  %s143_s6 = ssub.s32 %s859_s23, %s1162_s28 }
  0x15   : > { %s147_s7 = sadd.s32 1, %s835_s17  ;;  %s1166_s29 = smov (%p34_p5, %s1164_s29), 0 }
  0x16   : > { %1144 = sst [smem:[#allocation14_spill]] %s1166_s29  ;;  %p977_p7 = por %p53_p6, %p52_p4 }
  0x17   : > { %p157_p8 = scmp.ne.s32.totalorder %s835_s17, %s831_s16  ;;  %s36_s9 = ssub.s32 %s863_s24, %s1166_s29 }
  0x18   : > { %p158_p9 = scmp.eq.s32.totalorder %s574_s26, 3  ;;  %p37_p10 = scmp.eq.s32.totalorder %s36_s9, 0 }
  0x19   : > { %s144_s10 = sor.u32 %s143_s6, %s36_s9  ;;  %p163_p13 = scmp.ne.s32.totalorder %s831_s16, %s827_s15 }
  0x1a   : > { %p145_p11 = scmp.eq.s32.totalorder %s144_s10, 0  ;;  %p985_p12 = por %p158_p9, %p157_p8 }
  0x1b   : > { %s990_s12 = scalar_select %p37_p10, %s847_s20, %s39_s30  }
  0x1c   : > { %s993_s13 = scalar_select %p145_p11, %s835_s17, %s147_s7  }
  0x1d   : > { %1147 = sst [smem:[#allocation15_spill]] %s990_s12  ;;  %p164_p0 = scmp.eq.s32.totalorder %s575_s27, 3 }
  0x1e   : > { %p615_p1 = scmp.lt.s32.totalorder %s867_s25, 4  ;;  %s184_s18 = sand.u32 1, %s847_s20  }
  0x1f   : > { %p998_p2 = por %p164_p0, %p163_p13  ;;  %s578_s26 = sshll.u32 %s184_s18, 1 }
  0x20   : > { %s579_s6 = sshll.u32 %s863_s24, 1  ;;  %s1149_s0 = sld [smem:[#allocation16_spill]] }
  0x21   : > { %s188_s30 = scalar_lea.vmem [#allocation3], %s578_s26  ;;  %p608_p4 = pnand %p615_p1, %p967_p3 }
  0x22   : > { %s196_s28 = sshll.u32 %s188_s30, 4  ;;  %p580_p5 = scmp.ge.s32.totalorder %s867_s25, 1  ;;  %s197_s28 = int_to_ptr.vmem [resolvable:$true] %s196_s28 }
  0x23   : > { %p225_p6 = scmp.lt.s32.totalorder %s867_s25, 5  ;;  %s185_s27 = scalar_lea.sflag [#allocation4], %s184_s18 }
  0x25   : > { %p226_p8 = pnand %p580_p5, %p225_p6 }
  0x26   : > { %s192_s29 = scalar_lea.hbm %s1149_s0, %s579_s6  ;;  %s231_s7 = sand.u32 (!%p226_p8), 1, %s843_s19  }
  0x27   : > { %s194_s23 = sshll.u32 %s192_s29, 4  ;;  %229 = sbr.rel (%p226_p8) target bundleno = 402 (0x192), region = 36  ;;  %s195_s23 = int_to_ptr.hbm [resolvable:$true] %s194_s23 }
  0x28   : > { %610 = dma.hbm_to_vmem [thread:$0]  (!%p608_p4), %s195_s23, 32, %s197_s28, %s185_s27  }
  0x29   : > { %s581_s24 = sshll.u32 (!%p226_p8), %s231_s7, 1  ;;  %s232_s12 = scalar_lea.sflag (!%p226_p8), [#allocation4], %s231_s7 }
  0x2a   : > { %s1012_s9 = scalar_lea.vmem (!%p226_p8), [#allocation3], %s581_s24 }
  0x2c   : > { %818 = dma.done.wait (%p977_p7), %s232_s12, 32  }
  0x2d   : > { %820 = vsyncadd (%p977_p7), %s232_s12, 4294967264  ;;  %s1134_s23 = sand.u32 1, %s831_s16   ;;  %p276_p3 = scmp.lt.s32.totalorder %s855_s22, 1 }
  0x2e   : > { %s1022_s28 = sshll.u32 %s1134_s23, 2  ;;  %p278_p9 = scmp.lt.s32.totalorder %s851_s21, 1 }
  0x2f   : > { %s1026_s24 = scalar_select %p276_p3, %s855_s22, 1 }
  0x30   : > { %s279_s29 = scalar_select %p278_p9, %s851_s21, 1 }
  0x31   : > { %s583_s5 = sshll.u32 %s1026_s24, 1  ;;  %s290_s18 = scalar_lea.vmem %s1128_s3, %s1026_s24 }
  0x32   : > { %s281_s26 = sadd.s32 %s583_s5, %s279_s29  ;;  %s585_s6 = sshll.u32 %s279_s29, 3 }
  0x33   : > { %s584_s10 = sshll.u32 %s281_s26, 2  ;;  %s1037_s7 = scalar_lea.vmem %s1127_s2, %s585_s6 }
  0x34   : > { %s1042_s20 = scalar_lea.vmem %s1126_s1, %s584_s10  ;;  %s275_s19 = scalar_lea.vmem [#allocation6], %s1022_s28 }
  0x35   : > { %p586_p7 = scmp.ne.s32.totalorder %s851_s21, 0 }
  0x36   : > { %s869_s29 = smov (!%p586_p7), 127   ;;  %s870_s0 = smov (!%p586_p7), 126  }
  0x37   : > { %295 = sbr.rel (%p586_p7) target bundleno = 241 (0xf1), region = 44  ;;  %s871_s23 = smov (!%p586_p7), 118  }
  0x38   : > { %s872_s5 = smov (!%p586_p7), 117   ;;  %s873_s8 = smov (!%p586_p7), 116  }
  0x39   : > { %s874_s12 = smov (!%p586_p7), 108   ;;  %s875_s26 = smov (!%p586_p7), 107  }
  0x3a   : > { %s876_s6 = smov (!%p586_p7), 106  }
  0x3c   : > { %v299_v0 = vld [vmem:[%s1012_s9] sm:$0x3]  ;;  %vm297_vm0 = vcmask 648192   ;;  %vm308_vm1 = vcmask 650242  }
  0x3d   : > { %302 = vst [vmem:[#allocation1 + $0x1] ss:$2 sm:$0xff] %v299_v0  ;;  %v310_v1 = vld [vmem:[%s1012_s9] sm:$0x3] }
  0x3e   : > { %v319_v3 = vld [vmem:[%s1012_s9] sm:$0x3] }
  0x3f   : > { %v329_v5 = vld [vmem:[%s1012_s9] sm:$0x3] }
  0x40   : > { %v338_v7 = vld [vmem:[%s1012_s9] sm:$0x3] }
  0x41   : > { %v348_v9 = vld [vmem:[%s1012_s9] sm:$0x3] }
  0x42   : > { %v357_v11 = vld [vmem:[%s1012_s9] sm:$0x3] }
  0x43   : > { %v367_v13 = vld [vmem:[%s1012_s9] sm:$0x3] }
  0x44   : > { %v303_v2 = vld.sshfl [vmem:[#allocation1] sm:$0xff pattern:$0x75643120]  ;;  %v296_v16 = vld [vmem:[%s1012_s9] sm:$0x3] }
  0x45   : > { %305 = vrot.lane.b32.xlu0 %v303_v2, %s869_s29  ;;  %312 = vst [vmem:[#allocation1] ss:$2 sm:$0xff] %v310_v1 }
  0x46   : > { %298 = vst.msk [vmem:[#allocation2] sm:$0x3] %vm297_vm0, %v296_v16 }
  0x4c   : > { %v313_v4 = vld.sshfl [vmem:[#allocation1] sm:$0xff pattern:$0x75643120] }
  0x4d   : > { %322 = vst [vmem:[#allocation1 + $0x1] ss:$2 sm:$0xff] %v319_v3  ;;  %315 = vrot.lane.b32.xlu0 %v313_v4, %s870_s0 }
  0x54   : > { %v323_v6 = vld.sshfl [vmem:[#allocation1] sm:$0xff pattern:$0x75643120] }
  0x55   : > { %325 = vrot.lane.b32.xlu1 %v323_v6, %s871_s23  ;;  %331 = vst [vmem:[#allocation1] ss:$2 sm:$0xff] %v329_v5 }
  0x5c   : > { %v332_v8 = vld.sshfl [vmem:[#allocation1] sm:$0xff pattern:$0x75643120] }
  0x5d   : > { %334 = vrot.lane.b32.xlu1 %v332_v8, %s872_s5  ;;  %341 = vst [vmem:[#allocation1 + $0x1] ss:$2 sm:$0xff] %v338_v7 }
  0x64   : > { %v342_v10 = vld.sshfl [vmem:[#allocation1] sm:$0xff pattern:$0x75643120] }
  0x65   : > { %350 = vst [vmem:[#allocation1] ss:$2 sm:$0xff] %v348_v9  ;;  %344 = vrot.lane.b32.xlu2 %v342_v10, %s873_s8 }
  0x6c   : > { %v351_v12 = vld.sshfl [vmem:[#allocation1] sm:$0xff pattern:$0x75643120] }
  0x6d   : > { %360 = vst [vmem:[#allocation1 + $0x1] ss:$2 sm:$0xff] %v357_v11  ;;  %353 = vrot.lane.b32.xlu2 %v351_v12, %s874_s12 }
  0x74   : > { %v361_v14 = vld.sshfl [vmem:[#allocation1] sm:$0xff pattern:$0x75643120] }
  0x75   : > { %363 = vrot.lane.b32.xlu0 %v361_v14, %s875_s26  ;;  %369 = vst [vmem:[#allocation1] ss:$2 sm:$0xff] %v367_v13 }
  0x7c   : > { %v370_v15 = vld.sshfl [vmem:[#allocation1] sm:$0xff pattern:$0x75643120] }
  0x7d   : > { %372 = vrot.lane.b32.xlu1 %v370_v15, %s876_s6 }
  0xb7   : > { %v306_v17 = vpop.permute.xlu0 %305 }
  0xb8   : > { %309 = vst.msk [vmem:[#allocation2] sm:$0xc] %vm308_vm1, %v306_v17 }
  0xbf   : > { %v316_v18 = vpop.permute.xlu0 %315  ;;  %v345_v19 = vpop.permute.xlu2 %344 }
  0xc0   : > { %318 = vst.msk [vmem:[#allocation2 + $0x4] sm:$0x3] %vm297_vm0, %v316_v18 }
  0xc1   : > { %347 = vst.msk [vmem:[#allocation2 + $0x8] sm:$0xc] %vm308_vm1, %v345_v19 }
  0xc7   : > { %v326_v20 = vpop.permute.xlu1 %325  ;;  %v354_v21 = vpop.permute.xlu2 %353 }
  0xc8   : > { %328 = vst.msk [vmem:[#allocation2 + $0x4] sm:$0xc] %vm308_vm1, %v326_v20 }
  0xc9   : > { %356 = vst.msk [vmem:[#allocation2 + $0xc] sm:$0x3] %vm297_vm0, %v354_v21 }
  0xcf   : > { %v335_v22 = vpop.permute.xlu1 %334 }
  0xd0   : > { %337 = vst.msk [vmem:[#allocation2 + $0x8] sm:$0x3] %vm297_vm0, %v335_v22 }
  0xe7   : > { %v364_v23 = vpop.permute.xlu0 %363 }
  0xe8   : > { %366 = vst.msk [vmem:[#allocation2 + $0xc] sm:$0xc] %vm308_vm1, %v364_v23 }
  0xef   : > { %v373_v24 = vpop.permute.xlu1 %372 }
  0xf0   : > { %375 = vst.msk [vmem:[#allocation2 + $0x10] sm:$0x3] %vm297_vm0, %v373_v24 }
  0xf1 PF: > { %v382_v27 = vld [vmem:[%s1037_s7] sm:$0xff]  ;;  %vm407_vm2 = vcmask 1041408   ;;  %v877_v28 = vmov 0   ;;  %v602_v31 = vld [vmem:[#allocation2 + $0x8] sm:$0xff]  ;;  %v601_v32 = vld [vmem:[#allocation2] sm:$0xff]  ;;  %vm403_vm3 = vcmask 293888  }
  0xf2   : > { %714 = vset.pattern.permute.xlu0 %v877_v28  ;;  %v376_v33 = vld [vmem:[%s1042_s20] sm:$0xf]  ;;  %s597_s30 = sshll.u32 %s855_s22, 1  ;;  %s449_s24 = sshll.u32 %s275_s19, 4  ;;  %vm432_vm5 = vcmask 650240   ;;  %s450_s24 = int_to_ptr.vmem [resolvable:$true] %s449_s24 }
  0xf3   : > { %385 = vperm.xlu0 %714, %v382_v27   ;;  %v424_v34 = vld [vmem:[%s290_s18] sm:$0x1]  ;;  %s445_s27 = sadd.s32 %s851_s21, %s597_s30  ;;  %s1150_s21 = sand.u32 1, %s831_s16  }
  0xf4   : > { %v425_v35 = vunpack.c.l.bf16 %v424_v34  ;;  %s598_s7 = sshll.u32 %s445_s27, 2  ;;  %s435_s18 = scalar_lea.sflag [#allocation5], %s1150_s21 }
  0xf5   : > { %s447_s0 = scalar_lea.hbm %s1129_s4, %s598_s7  ;;  %s765_s26 = scalar_lea.hbm %s1129_s4, 16 }
  0xf6   : > { %v426_v37 = vperm.slane %v425_v35, 0  ;;  %s451_s22 = sshll.u32 %s447_s0, 4  ;;  %s452_s22 = int_to_ptr.hbm [resolvable:$true] %s451_s22 }
  0xf7   : > { %v381_v25 = vld [vmem:[#allocation2 + $0x10] sm:$0x3]  ;;  %s759_s23 = sshra.s32 %s452_s22, 4  ;;  %s760_s23 = int_to_ptr.hbm [resolvable:$true] %s759_s23 }
  0xf8   : > { %v397_v26 = vunpack.c.l.b16 %v381_v25  ;;  %s761_s5 = scalar_lea.hbm %s760_s23, 4  ;;  %p766_p0 = scmp.lt.s32.totalorder %s760_s23, %s1129_s4 }
  0xf9   : > { %p762_p10 = scmp.ne.s32.totalorder %s760_s23, %s761_s5  ;;  %p767_p1 = scmp.lt.s32.totalorder %s765_s26, %s761_s5 }
  0xfa   : > { %v400_v29 = vpack.c.b16 %v397_v26, %v397_v26 }
  0xfb   : > { %p763_p11 = pnand %p762_p10, %p985_p12  ;;  %p768_p4 = por %p767_p1, %p766_p0 }
  0xfc   : > { %v409_v30 = vsel %vm407_vm2, %v400_v29, 0 }
  0xfd   : > { %416 = vmatpush.bf16.msra.mxu0 %v409_v30  ;;  %p764_p13 = pneg %p763_p11 }
  0xff   : > { %p769_p5 = pnand %p768_p4, %p764_p13 }
 0x101   : > { %417 = vmatpush.bf16.msra.mxu0 %v602_v31 }
 0x105   : > { %418 = vmatpush.bf16.msra.mxu0 %v601_v32 }
 0x108   : > { %595 = vmatmul.msk.bf16.vlgmr.msra.gmra.mxu0 %vm403_vm3, %v376_v33 }
 0x165   : > { %v386_v36 = vpop.permute.xlu0 %385 }
 0x185   : > { %v420_v38 = vpop.f32.mrf.mxu0 }
 0x186   : > { %v421_v39 = vadd.f32 %v420_v38, %v386_v36 }
 0x188   : > { %v427_v40 = vadd.f32 %v426_v37, %v421_v39 }
 0x18a   : > { %vm428_vm4 = vcmp.ge.f32.partialorder %v427_v40, 0.0  ;;  %v429_v41 = vmul.f32 0.2, %v427_v40 }
 0x18c   : > { %v430_v42 = vsel %vm428_vm4, %v427_v40, %v429_v41 }
 0x18d   : > { %v422_v43 = vpop.f32.mrf.mxu0  ;;  %v431_v44 = vpack.c.bf16 %v430_v42, %v430_v42 }
 0x18f   : > { %433 = vst.msk [vmem:[%s275_s19] sm:$0xf] %vm432_vm5, %v431_v44 }
 0x190   : > { %772 = shalt.err (!%p769_p5)
}
 0x191   : > { %605 = dma.vmem_to_hbm [thread:$0]  (%p985_p12), %s450_s24, 64, %s452_s22, %s435_s18  }
 0x192 PF: > { %p616_p6 = scmp.ge.s32.totalorder %s867_s25, 2  ;;  %s463_s19 = sand.u32 1, %s827_s15  }
 0x193   : > { %s464_s28 = scalar_lea.sflag [#allocation5], %s463_s19 }
 0x194   : > { %p612_p8 = pnand %p616_p6, %p998_p2 }
 0x196   : > { %p613_p3 = pneg %p612_p8 }
 0x198   : > { %822 = dma.done.wait (%p613_p3), %s464_s28, 64  }
 0x199   : > { %824 = vsyncadd (%p613_p3), %s464_s28, 4294967232  ;;  %s20_s25 = sadd.s32 1, %s867_s25   ;;  %s1151_s18 = sld [smem:[#allocation9_spill]] }
 0x19a   : > { %p17_p9 = scmp.ge.s32.totalorder %s20_s25, 6   ;;  %s1152_s19 = sld [smem:[#allocation10_spill]] }
 0x19b   : > { %s1153_s20 = sld [smem:[#allocation15_spill]]  ;;  %s1158_s15 = smov %s831_s16 }
 0x19c   : > { %s1154_s21 = sld [smem:[#allocation11_spill]]  ;;  %s1159_s16 = smov %s835_s17 }
 0x19d   : > { %s1155_s22 = sld [smem:[#allocation12_spill]]  ;;  %s1160_s17 = smov %s993_s13 }
 0x19e   : > { %s1156_s23 = sld [smem:[#allocation13_spill]]  ;;  %19 = sbr.rel (!%p17_p9) target bundleno = 11 (0xb), region = 98 }
 0x19f   : > { %s1157_s24 = sld [smem:[#allocation14_spill]] }
 0x1a3   :  { %470 = vsyncpa [#allocation4], 1 }
 0x1a4   :  { %472 = vsyncpa [#allocation4 + $0x1], 1 }
 0x1a5   :  { %473 = vsyncpa [#allocation5], 1 }
 0x1a6   :  { %475 = vsyncpa [#allocation5 + $0x1], 1 }

</bundles_post_ra>
